<compile_context>
chip_gen: v5e
topology: v5e:2x2
jax: 0.10.0
libtpu: 0.0.40
codegen_flags: <defaults>
</compile_context>

<pallas_src>
import functools

import jax
import jax.numpy as jnp
from jax import lax
from jax.experimental import pallas as pl
from jax.experimental.pallas import tpu as pltpu

IGNORE_INDEX = -100
SMOOTH = 1e-07


def _loss_stats_kernel(logits_ref, tgt_ref,
                       inter_ref, cnt_ref, xsum_ref, ce_ref, nvalid_ref,
                       *, hw, t_hw, ragged):
    """Accumulate per-class dice statistics and CE sums over (C, TILE_HW) tiles.

    Block views (batch dim squeezed):
      logits_ref : (C, TILE_HW) float
      tgt_ref    : (1, TILE_HW) int32
      inter/cnt/xsum_ref : (C, 1) float32 accumulators (per-batch partials)
      ce/nvalid_ref      : (1, 1) float32 accumulators (per-batch partials)
    """
    i = pl.program_id(1)

    @pl.when(i == 0)
    def _():
        inter_ref[...] = jnp.zeros_like(inter_ref)
        cnt_ref[...] = jnp.zeros_like(cnt_ref)
        xsum_ref[...] = jnp.zeros_like(xsum_ref)
        ce_ref[...] = jnp.zeros_like(ce_ref)
        nvalid_ref[...] = jnp.zeros_like(nvalid_ref)

    x = logits_ref[...].astype(jnp.float32)          # (C, T)
    t = tgt_ref[...]                                 # (1, T) int32

    if ragged:
        # Mask lanes past the true pixel count (last tile only carries garbage
        # beyond hw); sanitize both x and t so all downstream math is exact.
        lane = lax.broadcasted_iota(jnp.int32, (1, t_hw), 1)
        pix = (i * t_hw + lane) < hw                 # (1, T) bool
        t = jnp.where(pix, t, IGNORE_INDEX)
        x = jnp.where(pix, x, 0.0)

    valid = (t != IGNORE_INDEX).astype(jnp.float32)  # (1, T)
    cls = lax.broadcasted_iota(jnp.int32, x.shape, 0)  # (C, T) class id per sublane
    onehot = (t == cls).astype(jnp.float32)          # (C, T); 0 wherever t == -100

    ohx = onehot * x                                 # (C, T), reused twice below

    # Dice statistics (onehot is already zero at ignored pixels, so these match
    # the `[target != -100]` masking in the reference).
    inter_ref[...] += jnp.sum(ohx, axis=1, keepdims=True)          # (C, 1)
    cnt_ref[...] += jnp.sum(onehot, axis=1, keepdims=True)         # (C, 1)
    xsum_ref[...] += jnp.sum(x * valid, axis=1, keepdims=True)     # (C, 1)
    # denominator = cnt + xsum, assembled in the wrapper.

    # Cross-entropy: -log_softmax(x)[target] over valid pixels.
    m = jnp.max(x, axis=0, keepdims=True)                          # (1, T)
    lse = jnp.log(jnp.sum(jnp.exp(x - m), axis=0, keepdims=True)) + m
    logit_t = jnp.sum(ohx, axis=0, keepdims=True)                  # (1, T)
    ce_pix = (lse - logit_t) * valid                               # (1, T)
    ce_ref[...] += jnp.sum(ce_pix, axis=1, keepdims=True)          # (1, 1)
    nvalid_ref[...] += jnp.sum(valid, axis=1, keepdims=True)       # (1, 1)


def dice_and_ce_loss_mix(output, target, dice_factor=0.5, smooth=SMOOTH,
                         tile_hw=16384):
    """Forward pass of DiceAndCrossEntropyLossMix (weight=None case).

    output: (N, C, H, W) float logits (any float dtype; upcast happens in-kernel)
    target: (N, H, W) int labels in [0, C) or -100 (ignored)
    returns (mixed_loss, dice_loss, cross_entropy_loss) as float32 scalars.
    """
    n, c, h, w = output.shape
    hw = h * w

    # Free, contiguous reshapes — no transpose / pad / cast of the logits slab.
    logits = output.reshape(n, c, hw)
    tgt = target.reshape(n, 1, hw).astype(jnp.int32)

    if hw <= tile_hw:
        t_hw = hw                 # block == full dim, always legal
        num_tiles = 1
    else:
        t_hw = tile_hw            # multiple of 128
        num_tiles = pl.cdiv(hw, t_hw)
    ragged = (num_tiles * t_hw != hw)

    kernel = functools.partial(_loss_stats_kernel, hw=hw, t_hw=t_hw, ragged=ragged)

    stat_spec = pl.BlockSpec((None, c, 1), lambda b, i: (b, 0, 0))
    scal_spec = pl.BlockSpec((None, 1, 1), lambda b, i: (b, 0, 0))

    inter, cnt, xsum, ce_sum, n_valid = pl.pallas_call(
        kernel,
        out_shape=(
            jax.ShapeDtypeStruct((n, c, 1), jnp.float32),   # per-(batch, class) intersection
            jax.ShapeDtypeStruct((n, c, 1), jnp.float32),   # per-(batch, class) onehot counts
            jax.ShapeDtypeStruct((n, c, 1), jnp.float32),   # per-(batch, class) sum of logits over valid px
            jax.ShapeDtypeStruct((n, 1, 1), jnp.float32),   # per-batch CE sum over valid pixels
            jax.ShapeDtypeStruct((n, 1, 1), jnp.float32),   # per-batch number of valid pixels
        ),
        grid=(n, num_tiles),
        in_specs=[
            pl.BlockSpec((None, c, t_hw), lambda b, i: (b, 0, i)),
            pl.BlockSpec((None, 1, t_hw), lambda b, i: (b, 0, i)),
        ],
        out_specs=(stat_spec, stat_spec, stat_spec, scal_spec, scal_spec),
        compiler_params=pltpu.CompilerParams(
            dimension_semantics=("parallel", "arbitrary")),
    )(logits, tgt)

    inter = jnp.sum(inter, axis=(0, 2))   # (C,)
    cnt = jnp.sum(cnt, axis=(0, 2))       # (C,)
    xsum = jnp.sum(xsum, axis=(0, 2))     # (C,)
    denom = cnt + xsum                    # == sum((onehot + x) over valid pixels)

    # DiceLoss with weight=None: classes = unique(target) \ {-100},
    # each present class weighted 1/len(classes).
    present = cnt > 0
    n_classes = jnp.sum(present.astype(jnp.float32))
    dice_per_class = 1.0 - (2.0 * inter + smooth) / (denom + smooth)
    dice = jnp.sum(jnp.where(present, dice_per_class / n_classes, 0.0))

    # nn.CrossEntropyLoss(weight=None): mean over non-ignored pixels.
    ce = jnp.sum(ce_sum) / jnp.sum(n_valid)

    mixed = dice_factor * dice + (1.0 - dice_factor) * ce
    return mixed, dice, ce


def _reference(output, target, dice_factor=0.5, smooth=SMOOTH):
    """Pure-JAX reference mirroring the PyTorch semantics (for sanity check)."""
    n, c, h, w = output.shape
    logits = jnp.transpose(output, (0, 2, 3, 1)).reshape(-1, c).astype(jnp.float32)
    tgt = target.reshape(-1).astype(jnp.int32)
    valid = tgt != IGNORE_INDEX
    present = jnp.array([jnp.any(tgt == ci) for ci in range(c)])
    n_classes = jnp.sum(present.astype(jnp.float32))
    dice = 0.0
    for ci in range(c):
        mask = (tgt == ci).astype(jnp.float32)
        vf = valid.astype(jnp.float32)
        inter = jnp.sum(mask * logits[:, ci] * vf)
        denom = jnp.sum((mask + logits[:, ci]) * vf)
        cl = 1.0 - (2.0 * inter + smooth) / (denom + smooth)
        dice = dice + jnp.where(present[ci], cl / n_classes, 0.0)
    logp = jax.nn.log_softmax(logits, axis=-1)
    safe_t = jnp.where(valid, tgt, 0)
    nll = -jnp.take_along_axis(logp, safe_t[:, None], axis=1)[:, 0]
    ce = jnp.sum(jnp.where(valid, nll, 0.0)) / jnp.sum(valid.astype(jnp.float32))
    return dice_factor * dice + (1 - dice_factor) * ce, dice, ce


if __name__ == "__main__":
    key = jax.random.PRNGKey(0)
    k1, k2, k3 = jax.random.split(key, 3)
    N, C, H, W = 2, 4, 16, 16

    output = jax.random.normal(k1, (N, C, H, W), dtype=jnp.float32)
    target = jax.random.randint(k2, (N, H, W), 0, C)
    ignore_mask = jax.random.uniform(k3, (N, H, W)) < 0.1
    target = jnp.where(ignore_mask, IGNORE_INDEX, target).astype(jnp.int32)

    mixed, dice, ce = dice_and_ce_loss_mix(output, target)
    jax.block_until_ready((mixed, dice, ce))

    mixed_r, dice_r, ce_r = _reference(output, target)
    assert jnp.allclose(mixed, mixed_r, rtol=1e-4, atol=1e-5)
    assert jnp.allclose(dice, dice_r, rtol=1e-4, atol=1e-5)
    assert jnp.allclose(ce, ce_r, rtol=1e-4, atol=1e-5)

    print("KERNEL_OK")
</pallas_src>

<mosaic_0001>
module attributes {stable_mosaic.version = 11 : i64} {
  func.func @_loss_stats_kernel(%arg0: i32, %arg1: i32, %arg2: memref<1x4x256xf32, #tpu.memory_space<vmem>>, %arg3: memref<1x1x256xi32, #tpu.memory_space<vmem>>, %arg4: memref<1x4x1xf32, #tpu.memory_space<vmem>>, %arg5: memref<1x4x1xf32, #tpu.memory_space<vmem>>, %arg6: memref<1x4x1xf32, #tpu.memory_space<vmem>>, %arg7: memref<1x1x1xf32, #tpu.memory_space<vmem>>, %arg8: memref<1x1x1xf32, #tpu.memory_space<vmem>>) attributes {dimension_semantics = [#tpu.dimension_semantics<parallel>, #tpu.dimension_semantics<arbitrary>], iteration_bounds = array<i64: 2, 1>, scalar_prefetch = 0 : i64, scratch_operands = 0 : i64, tpu.core_type = #tpu.core_type<tc>, window_params = [{transform_indices = @transform_0, window_bounds = array<i64: 1, 4, 256>}, {transform_indices = @transform_1, window_bounds = array<i64: 1, 1, 256>}, {transform_indices = @transform_2, window_bounds = array<i64: 1, 4, 1>}, {transform_indices = @transform_3, window_bounds = array<i64: 1, 4, 1>}, {transform_indices = @transform_4, window_bounds = array<i64: 1, 4, 1>}, {transform_indices = @transform_5, window_bounds = array<i64: 1, 1, 1>}, {transform_indices = @transform_6, window_bounds = array<i64: 1, 1, 1>}]} {
    %c0_i32 = arith.constant 0 : i32
    %0 = arith.cmpi eq, %arg1, %c0_i32 : i32
    %1 = arith.extui %0 : i1 to i32
    %c0_i32_0 = arith.constant 0 : i32
    %2 = arith.cmpi ne, %1, %c0_i32_0 : i32
    scf.if %2 {
      %cst_43 = arith.constant 0.000000e+00 : f32
      %72 = vector.broadcast %cst_43 : f32 to vector<4x1xf32>
      %c0_44 = arith.constant 0 : index
      %c0_45 = arith.constant 0 : index
      %c0_46 = arith.constant 0 : index
      %73 = vector.load %arg4[%c0_44, %c0_45, %c0_46] : memref<1x4x1xf32, #tpu.memory_space<vmem>>, vector<1x4x1xf32>
      %74 = vector.shape_cast %73 : vector<1x4x1xf32> to vector<4x1xf32>
      %75 = vector.shape_cast %72 : vector<4x1xf32> to vector<1x4x1xf32>
      tpu.vector_store %arg4[%c0_44, %c0_45, %c0_46], %75 {strides = array<i32>} : memref<1x4x1xf32, #tpu.memory_space<vmem>>, vector<1x4x1xf32>,
      %cst_47 = arith.constant 0.000000e+00 : f32
      %76 = vector.broadcast %cst_47 : f32 to vector<4x1xf32>
      %c0_48 = arith.constant 0 : index
      %c0_49 = arith.constant 0 : index
      %c0_50 = arith.constant 0 : index
      %77 = vector.load %arg5[%c0_48, %c0_49, %c0_50] : memref<1x4x1xf32, #tpu.memory_space<vmem>>, vector<1x4x1xf32>
      %78 = vector.shape_cast %77 : vector<1x4x1xf32> to vector<4x1xf32>
      %79 = vector.shape_cast %76 : vector<4x1xf32> to vector<1x4x1xf32>
      tpu.vector_store %arg5[%c0_48, %c0_49, %c0_50], %79 {strides = array<i32>} : memref<1x4x1xf32, #tpu.memory_space<vmem>>, vector<1x4x1xf32>,
      %cst_51 = arith.constant 0.000000e+00 : f32
      %80 = vector.broadcast %cst_51 : f32 to vector<4x1xf32>
      %c0_52 = arith.constant 0 : index
      %c0_53 = arith.constant 0 : index
      %c0_54 = arith.constant 0 : index
      %81 = vector.load %arg6[%c0_52, %c0_53, %c0_54] : memref<1x4x1xf32, #tpu.memory_space<vmem>>, vector<1x4x1xf32>
      %82 = vector.shape_cast %81 : vector<1x4x1xf32> to vector<4x1xf32>
      %83 = vector.shape_cast %80 : vector<4x1xf32> to vector<1x4x1xf32>
      tpu.vector_store %arg6[%c0_52, %c0_53, %c0_54], %83 {strides = array<i32>} : memref<1x4x1xf32, #tpu.memory_space<vmem>>, vector<1x4x1xf32>,
      %cst_55 = arith.constant 0.000000e+00 : f32
      %84 = vector.broadcast %cst_55 : f32 to vector<1x1xf32>
      %c0_56 = arith.constant 0 : index
      %c0_57 = arith.constant 0 : index
      %c0_58 = arith.constant 0 : index
      %85 = vector.load %arg7[%c0_56, %c0_57, %c0_58] : memref<1x1x1xf32, #tpu.memory_space<vmem>>, vector<1x1x1xf32>
      %86 = vector.shape_cast %85 : vector<1x1x1xf32> to vector<1x1xf32>
      %87 = vector.shape_cast %84 : vector<1x1xf32> to vector<1x1x1xf32>
      tpu.vector_store %arg7[%c0_56, %c0_57, %c0_58], %87 {strides = array<i32>} : memref<1x1x1xf32, #tpu.memory_space<vmem>>, vector<1x1x1xf32>,
      %cst_59 = arith.constant 0.000000e+00 : f32
      %88 = vector.broadcast %cst_59 : f32 to vector<1x1xf32>
      %c0_60 = arith.constant 0 : index
      %c0_61 = arith.constant 0 : index
      %c0_62 = arith.constant 0 : index
      %89 = vector.load %arg8[%c0_60, %c0_61, %c0_62] : memref<1x1x1xf32, #tpu.memory_space<vmem>>, vector<1x1x1xf32>
      %90 = vector.shape_cast %89 : vector<1x1x1xf32> to vector<1x1xf32>
      %91 = vector.shape_cast %88 : vector<1x1xf32> to vector<1x1x1xf32>
      tpu.vector_store %arg8[%c0_60, %c0_61, %c0_62], %91 {strides = array<i32>} : memref<1x1x1xf32, #tpu.memory_space<vmem>>, vector<1x1x1xf32>,
    } else {
    }
    %c0 = arith.constant 0 : index
    %c0_1 = arith.constant 0 : index
    %c0_2 = arith.constant 0 : index
    %3 = vector.load %arg2[%c0, %c0_1, %c0_2] : memref<1x4x256xf32, #tpu.memory_space<vmem>>, vector<1x4x256xf32>
    %4 = vector.shape_cast %3 : vector<1x4x256xf32> to vector<4x256xf32>
    %c0_3 = arith.constant 0 : index
    %c0_4 = arith.constant 0 : index
    %c0_5 = arith.constant 0 : index
    %5 = vector.load %arg3[%c0_3, %c0_4, %c0_5] : memref<1x1x256xi32, #tpu.memory_space<vmem>>, vector<1x1x256xi32>
    %6 = vector.shape_cast %5 : vector<1x1x256xi32> to vector<1x256xi32>
    %c-100_i32 = arith.constant -100 : i32
    %7 = vector.broadcast %c-100_i32 : i32 to vector<1x256xi32>
    %8 = arith.cmpi ne, %6, %7 : vector<1x256xi32>
    %9 = arith.extui %8 : vector<1x256xi1> to vector<1x256xi32>
    %10 = arith.sitofp %9 : vector<1x256xi32> to vector<1x256xf32>
    %11 = tpu.iota {dimensions = array<i32: 0>} : vector<4x256xi32>
    %12 = vector.broadcast %6 : vector<1x256xi32> to vector<4x256xi32>
    %13 = arith.cmpi eq, %12, %11 : vector<4x256xi32>
    %14 = arith.extui %13 : vector<4x256xi1> to vector<4x256xi32>
    %15 = arith.sitofp %14 : vector<4x256xi32> to vector<4x256xf32>
    %16 = arith.mulf %15, %4 : vector<4x256xf32>
    %c0_6 = arith.constant 0 : index
    %c0_7 = arith.constant 0 : index
    %c0_8 = arith.constant 0 : index
    %17 = vector.load %arg4[%c0_6, %c0_7, %c0_8] : memref<1x4x1xf32, #tpu.memory_space<vmem>>, vector<1x4x1xf32>
    %18 = vector.shape_cast %17 : vector<1x4x1xf32> to vector<4x1xf32>
    %cst = arith.constant dense<0.000000e+00> : vector<4xf32>
    %19 = vector.multi_reduction <add>, %16, %cst [1] : vector<4x256xf32> to vector<4xf32>
    %20 = vector.shape_cast %19 : vector<4xf32> to vector<4x1xf32>
    %21 = arith.addf %18, %20 : vector<4x1xf32>
    %c0_9 = arith.constant 0 : index
    %c0_10 = arith.constant 0 : index
    %c0_11 = arith.constant 0 : index
    %22 = vector.load %arg4[%c0_9, %c0_10, %c0_11] : memref<1x4x1xf32, #tpu.memory_space<vmem>>, vector<1x4x1xf32>
    %23 = vector.shape_cast %22 : vector<1x4x1xf32> to vector<4x1xf32>
    %24 = vector.shape_cast %21 : vector<4x1xf32> to vector<1x4x1xf32>
    tpu.vector_store %arg4[%c0_9, %c0_10, %c0_11], %24 {strides = array<i32>} : memref<1x4x1xf32, #tpu.memory_space<vmem>>, vector<1x4x1xf32>,
    %c0_12 = arith.constant 0 : index
    %c0_13 = arith.constant 0 : index
    %c0_14 = arith.constant 0 : index
    %25 = vector.load %arg5[%c0_12, %c0_13, %c0_14] : memref<1x4x1xf32, #tpu.memory_space<vmem>>, vector<1x4x1xf32>
    %26 = vector.shape_cast %25 : vector<1x4x1xf32> to vector<4x1xf32>
    %cst_15 = arith.constant dense<0.000000e+00> : vector<4xf32>
    %27 = vector.multi_reduction <add>, %15, %cst_15 [1] : vector<4x256xf32> to vector<4xf32>
    %28 = vector.shape_cast %27 : vector<4xf32> to vector<4x1xf32>
    %29 = arith.addf %26, %28 : vector<4x1xf32>
    %c0_16 = arith.constant 0 : index
    %c0_17 = arith.constant 0 : index
    %c0_18 = arith.constant 0 : index
    %30 = vector.load %arg5[%c0_16, %c0_17, %c0_18] : memref<1x4x1xf32, #tpu.memory_space<vmem>>, vector<1x4x1xf32>
    %31 = vector.shape_cast %30 : vector<1x4x1xf32> to vector<4x1xf32>
    %32 = vector.shape_cast %29 : vector<4x1xf32> to vector<1x4x1xf32>
    tpu.vector_store %arg5[%c0_16, %c0_17, %c0_18], %32 {strides = array<i32>} : memref<1x4x1xf32, #tpu.memory_space<vmem>>, vector<1x4x1xf32>,
    %c0_19 = arith.constant 0 : index
    %c0_20 = arith.constant 0 : index
    %c0_21 = arith.constant 0 : index
    %33 = vector.load %arg6[%c0_19, %c0_20, %c0_21] : memref<1x4x1xf32, #tpu.memory_space<vmem>>, vector<1x4x1xf32>
    %34 = vector.shape_cast %33 : vector<1x4x1xf32> to vector<4x1xf32>
    %35 = vector.broadcast %10 : vector<1x256xf32> to vector<4x256xf32>
    %36 = arith.mulf %4, %35 : vector<4x256xf32>
    %cst_22 = arith.constant dense<0.000000e+00> : vector<4xf32>
    %37 = vector.multi_reduction <add>, %36, %cst_22 [1] : vector<4x256xf32> to vector<4xf32>
    %38 = vector.shape_cast %37 : vector<4xf32> to vector<4x1xf32>
    %39 = arith.addf %34, %38 : vector<4x1xf32>
    %c0_23 = arith.constant 0 : index
    %c0_24 = arith.constant 0 : index
    %c0_25 = arith.constant 0 : index
    %40 = vector.load %arg6[%c0_23, %c0_24, %c0_25] : memref<1x4x1xf32, #tpu.memory_space<vmem>>, vector<1x4x1xf32>
    %41 = vector.shape_cast %40 : vector<1x4x1xf32> to vector<4x1xf32>
    %42 = vector.shape_cast %39 : vector<4x1xf32> to vector<1x4x1xf32>
    tpu.vector_store %arg6[%c0_23, %c0_24, %c0_25], %42 {strides = array<i32>} : memref<1x4x1xf32, #tpu.memory_space<vmem>>, vector<1x4x1xf32>,
    %cst_26 = arith.constant dense<0xFF800000> : vector<256xf32>
    %43 = vector.multi_reduction <maximumf>, %4, %cst_26 [0] : vector<4x256xf32> to vector<256xf32>
    %44 = vector.shape_cast %43 : vector<256xf32> to vector<1x256xf32>
    %45 = vector.broadcast %44 : vector<1x256xf32> to vector<4x256xf32>
    %46 = arith.subf %4, %45 : vector<4x256xf32>
    %47 = math.exp %46 : vector<4x256xf32>
    %cst_27 = arith.constant dense<0.000000e+00> : vector<256xf32>
    %48 = vector.multi_reduction <add>, %47, %cst_27 [0] : vector<4x256xf32> to vector<256xf32>
    %49 = vector.shape_cast %48 : vector<256xf32> to vector<1x256xf32>
    %50 = math.log %49 : vector<1x256xf32>
    %51 = arith.addf %50, %44 : vector<1x256xf32>
    %cst_28 = arith.constant dense<0.000000e+00> : vector<256xf32>
    %52 = vector.multi_reduction <add>, %16, %cst_28 [0] : vector<4x256xf32> to vector<256xf32>
    %53 = vector.shape_cast %52 : vector<256xf32> to vector<1x256xf32>
    %54 = arith.subf %51, %53 : vector<1x256xf32>
    %55 = arith.mulf %54, %10 : vector<1x256xf32>
    %c0_29 = arith.constant 0 : index
    %c0_30 = arith.constant 0 : index
    %c0_31 = arith.constant 0 : index
    %56 = vector.load %arg7[%c0_29, %c0_30, %c0_31] : memref<1x1x1xf32, #tpu.memory_space<vmem>>, vector<1x1x1xf32>
    %57 = vector.shape_cast %56 : vector<1x1x1xf32> to vector<1x1xf32>
    %cst_32 = arith.constant dense<0.000000e+00> : vector<1xf32>
    %58 = vector.multi_reduction <add>, %55, %cst_32 [1] : vector<1x256xf32> to vector<1xf32>
    %59 = vector.shape_cast %58 : vector<1xf32> to vector<1x1xf32>
    %60 = arith.addf %57, %59 : vector<1x1xf32>
    %c0_33 = arith.constant 0 : index
    %c0_34 = arith.constant 0 : index
    %c0_35 = arith.constant 0 : index
    %61 = vector.load %arg7[%c0_33, %c0_34, %c0_35] : memref<1x1x1xf32, #tpu.memory_space<vmem>>, vector<1x1x1xf32>
    %62 = vector.shape_cast %61 : vector<1x1x1xf32> to vector<1x1xf32>
    %63 = vector.shape_cast %60 : vector<1x1xf32> to vector<1x1x1xf32>
    tpu.vector_store %arg7[%c0_33, %c0_34, %c0_35], %63 {strides = array<i32>} : memref<1x1x1xf32, #tpu.memory_space<vmem>>, vector<1x1x1xf32>,
    %c0_36 = arith.constant 0 : index
    %c0_37 = arith.constant 0 : index
    %c0_38 = arith.constant 0 : index
    %64 = vector.load %arg8[%c0_36, %c0_37, %c0_38] : memref<1x1x1xf32, #tpu.memory_space<vmem>>, vector<1x1x1xf32>
    %65 = vector.shape_cast %64 : vector<1x1x1xf32> to vector<1x1xf32>
    %cst_39 = arith.constant dense<0.000000e+00> : vector<1xf32>
    %66 = vector.multi_reduction <add>, %10, %cst_39 [1] : vector<1x256xf32> to vector<1xf32>
    %67 = vector.shape_cast %66 : vector<1xf32> to vector<1x1xf32>
    %68 = arith.addf %65, %67 : vector<1x1xf32>
    %c0_40 = arith.constant 0 : index
    %c0_41 = arith.constant 0 : index
    %c0_42 = arith.constant 0 : index
    %69 = vector.load %arg8[%c0_40, %c0_41, %c0_42] : memref<1x1x1xf32, #tpu.memory_space<vmem>>, vector<1x1x1xf32>
    %70 = vector.shape_cast %69 : vector<1x1x1xf32> to vector<1x1xf32>
    %71 = vector.shape_cast %68 : vector<1x1xf32> to vector<1x1x1xf32>
    tpu.vector_store %arg8[%c0_40, %c0_41, %c0_42], %71 {strides = array<i32>} : memref<1x1x1xf32, #tpu.memory_space<vmem>>, vector<1x1x1xf32>,
    return
  }
  func.func @transform_0(%arg0: i32, %arg1: i32) -> (i32, i32, i32) {
    %c0_i32 = arith.constant 0 : i32
    %c0_i32_0 = arith.constant 0 : i32
    return %arg0, %c0_i32, %arg1 : i32, i32, i32
  }
  func.func @transform_1(%arg0: i32, %arg1: i32) -> (i32, i32, i32) {
    %c0_i32 = arith.constant 0 : i32
    %c0_i32_0 = arith.constant 0 : i32
    return %arg0, %c0_i32, %arg1 : i32, i32, i32
  }
  func.func @transform_2(%arg0: i32, %arg1: i32) -> (i32, i32, i32) {
    %c0_i32 = arith.constant 0 : i32
    %c0_i32_0 = arith.constant 0 : i32
    %c0_i32_1 = arith.constant 0 : i32
    return %arg0, %c0_i32, %c0_i32_0 : i32, i32, i32
  }
  func.func @transform_3(%arg0: i32, %arg1: i32) -> (i32, i32, i32) {
    %c0_i32 = arith.constant 0 : i32
    %c0_i32_0 = arith.constant 0 : i32
    %c0_i32_1 = arith.constant 0 : i32
    return %arg0, %c0_i32, %c0_i32_0 : i32, i32, i32
  }
  func.func @transform_4(%arg0: i32, %arg1: i32) -> (i32, i32, i32) {
    %c0_i32 = arith.constant 0 : i32
    %c0_i32_0 = arith.constant 0 : i32
    %c0_i32_1 = arith.constant 0 : i32
    return %arg0, %c0_i32, %c0_i32_0 : i32, i32, i32
  }
  func.func @transform_5(%arg0: i32, %arg1: i32) -> (i32, i32, i32) {
    %c0_i32 = arith.constant 0 : i32
    %c0_i32_0 = arith.constant 0 : i32
    %c0_i32_1 = arith.constant 0 : i32
    return %arg0, %c0_i32, %c0_i32_0 : i32, i32, i32
  }
  func.func @transform_6(%arg0: i32, %arg1: i32) -> (i32, i32, i32) {
    %c0_i32 = arith.constant 0 : i32
    %c0_i32_0 = arith.constant 0 : i32
    %c0_i32_1 = arith.constant 0 : i32
    return %arg0, %c0_i32, %c0_i32_0 : i32, i32, i32
  }
}

</mosaic_0001>

<bundles_post_ra>
// kernel: tpu_custom_call.1
= control target key start
LH: loop header
LB: loop body
LE: loop exit
PB: predicated region body
PF: predicated region fallthrough
CT: control target
= control target key end

     0   :  { %12 = vsyncpa [#allocation3], 0  ;;  %s1168_s0 = inlined_call_operand.hbm [shape: f32[2,4,256], index: 0, kind: input, shape index: {}]   ;;  %s1169_s1 = inlined_call_operand.hbm [shape: s32[2,1,256], index: 1, kind: input, shape index: {}]   ;;  %s1170_s2 = inlined_call_operand.vmem [shape: f32[2,4,1], index: 2, kind: output, shape index: {0}]   ;;  %s1171_s3 = inlined_call_operand.vmem [shape: f32[2,4,1], index: 3, kind: output, shape index: {1}]   ;;  %s1172_s4 = inlined_call_operand.vmem [shape: f32[2,4,1], index: 4, kind: output, shape index: {2}]   ;;  %s1173_s5 = inlined_call_operand.vmem [shape: f32[2,1,1], index: 5, kind: output, shape index: {3}]   ;;  %s1174_s6 = inlined_call_operand.vmem [shape: f32[2,1,1], index: 6, kind: output, shape index: {4}]  }
   0x1   :  { %14 = vsyncpa [#allocation3 + $0x1], 0 }
   0x2   :  { %15 = vsyncpa [#allocation5], 0 }
   0x3   :  { %17 = vsyncpa [#allocation5 + $0x1], 0  ;;  %s983_s21 = smov 0   ;;  %s985_s22 = smov 0  }
   0x4   :  { %s987_s23 = smov 0   ;;  %s989_s24 = smov 0  }
   0x5   :  { %s991_s25 = smov 0   ;;  %s993_s26 = smov 0  }
   0x6 LB: > { %s743_s27 = sadd.s32 4294967295, %s945_s26   ;;  %s35_s28 = sadd.s32 1, %s941_s25  ;;  %s945_s26 = sphi %s993_s26, %s23_s26   ;;  %s941_s25 = sphi %s991_s25, %s1182_s25   ;;  %s937_s24 = sphi %s989_s24, %s1181_s24   ;;  %s933_s23 = sphi %s987_s23, %s1180_s23   ;;  %s929_s22 = sphi %s985_s22, %s1179_s22   ;;  %s925_s21 = sphi %s983_s21, %s1178_s21  }
   0x7   : > { %p37_p0 = scmp.ge.s32.totalorder %s35_s28, 2  ;;  %s44_s29 = sadd.s32 1, %s933_s23 }
   0x8   : > { %p51_p1 = scmp.ne.s32.totalorder %s933_s23, %s929_s22  ;;  %p52_p2 = scmp.eq.s32.totalorder %s945_s26, 0 }
   0x9   : > { %s1184_s28 = smov (%p37_p0, %s35_s28), 0  ;;  %p57_p4 = scmp.ne.s32.totalorder %s929_s22, %s925_s21 }
   0xa   : > { %p1019_p3 = por %p52_p2, %p51_p1  ;;  %s39_s7 = ssub.s32 %s941_s25, %s1184_s28 }
   0xb   : > { %p58_p5 = scmp.eq.s32.totalorder %s743_s27, 0  ;;  %p42_p6 = scmp.eq.s32.totalorder %s39_s7, 0 }
   0xc   : > { %p775_p8 = scmp.lt.s32.totalorder %s945_s26, 2  ;;  %s239_s10 = sand.u32 1, %s933_s23  }
   0xd   : > { %p1026_p7 = por %p58_p5, %p57_p4  ;;  %s763_s11 = sshll.u32 %s941_s25, 3 }
   0xe   : > { %s1032_s9 = scalar_select %p42_p6, %s933_s23, %s44_s29  }
   0xf   : > { %s747_s12 = sshll.u32 %s239_s10, 3  ;;  %s250_s15 = scalar_lea.hbm %s1168_s0, %s763_s11 }
  0x10   : > { %s252_s16 = sshll.u32 %s250_s15, 4  ;;  %s243_s17 = scalar_lea.vmem [#allocation2], %s747_s12  ;;  %s253_s16 = int_to_ptr.hbm [resolvable:$true] %s252_s16 }
  0x11   : > { %s254_s18 = sshll.u32 %s243_s17, 4  ;;  %p1041_p9 = pnand %p775_p8, %p1019_p3  ;;  %s255_s18 = int_to_ptr.vmem [resolvable:$true] %s254_s18 }
  0x12   : > { %p752_p10 = scmp.ge.s32.totalorder %s945_s26, 1  ;;  %p280_p11 = scmp.lt.s32.totalorder %s945_s26, 3 }
  0x13   : > { %s750_s20 = sshll.u32 %s239_s10, 1  ;;  %s240_s21 = scalar_lea.sflag [#allocation3], %s239_s10 }
  0x14   : > { %771 = dma.hbm_to_vmem [thread:$0]  (!%p1041_p9), %s253_s16, 128, %s255_s18, %s240_s21  }
  0x15   : > { %p281_p12 = pnand %p752_p10, %p280_p11  ;;  %s751_s27 = sshll.u32 %s941_s25, 1 }
  0x16   : > { %s265_s29 = scalar_lea.vmem [#allocation4], %s750_s20  ;;  %s271_s30 = scalar_lea.hbm %s1169_s1, %s751_s27 }
  0x17   : > { %s275_s7 = sshll.u32 %s265_s29, 4  ;;  %s273_s13 = sshll.u32 %s271_s30, 4  ;;  %s276_s7 = int_to_ptr.vmem [resolvable:$true] %s275_s7  ;;  %s274_s13 = int_to_ptr.hbm [resolvable:$true] %s273_s13 }
  0x18   : > { %s262_s14 = scalar_lea.sflag [#allocation5], %s239_s10  ;;  %284 = sbr.rel (%p281_p12) target bundleno = 245 (0xf5), region = 28 }
  0x19   : > { %774 = dma.hbm_to_vmem [thread:$0]  (!%p1041_p9), %s274_s13, 32, %s276_s7, %s262_s14  }
  0x1a   : > { %s286_s15 = sand.u32 (!%p281_p12), 1, %s929_s22  }
  0x1b   : > { %s753_s17 = sshll.u32 (!%p281_p12), %s286_s15, 3  ;;  %s287_s16 = scalar_lea.sflag (!%p281_p12), [#allocation3], %s286_s15 }
  0x1c   : > { %s290_s18 = scalar_lea.vmem (!%p281_p12), [#allocation2], %s753_s17 }
  0x1d   : > { %916 = dma.done.wait (%p1026_p7), %s287_s16, 128  }
  0x1e   : > { %918 = vsyncadd (%p1026_p7), %s287_s16, 4294967168  ;;  %s754_s20 = sshll.u32 %s286_s15, 1  ;;  %s297_s21 = scalar_lea.sflag [#allocation5], %s286_s15 }
  0x1f   : > { %s300_s27 = scalar_lea.vmem [#allocation4], %s754_s20 }
  0x20   : > { %920 = dma.done.wait (%p1026_p7), %s297_s21, 32  }
  0x21   : > { %922 = vsyncadd (%p1026_p7), %s297_s21, 4294967264  ;;  %v384_v0 = vlaneseq  ;;  %v379_v2 = vld [vmem:[%s290_s18] sm:$0xff]  ;;  %v380_v3 = vld [vmem:[%s300_s27] sm:$0x3]  ;;  %v947_v6 = vmov 0.0   ;;  %vm513_vm1 = vcmask 1040384  }
  0x22   : > { %vm381_vm0 = vcmp.ne.s32.totalorder %v380_v3, 4294967196  ;;  %395 = vst [vmem:[#allocation1] ss:$2 sm:$0xff] %v379_v2  ;;  %v386_v4 = vperm.slane %v380_v3, 0  ;;  %v387_v5 = vperm.slane %v380_v3, 1  ;;  %vm403_vm4 = vcmask 1043456  }
  0x23   : > { %v385_v1 = vshrl.u32 %v384_v0, 7  ;;  %v758_v7 = vsel %vm381_vm0, 1.0, %v947_v6  ;;  %p350_p13 = scmp.lt.s32.totalorder %s937_s24, 1  ;;  %vm372_vm5 = vcmask 3072   ;;  %vm376_vm6 = vcmask 0  }
  0x24   : > { %v1065_v8 = vperm.slane %v758_v7, 0  ;;  %v1067_v9 = vperm.slane %v758_v7, 1 }
  0x25   : > { %vm388_vm2 = vcmp.eq.s32.totalorder %v386_v4, %v385_v1  ;;  %vm389_vm3 = vcmp.eq.s32.totalorder %v387_v5, %v385_v1  ;;  %s1186_s24 = smov (!%p350_p13, %s937_s24), 1 }
  0x26   : > { %v424_v10 = vrot.slane %v1067_v9, 4  ;;  %v523_v11 = vsel %vm513_vm1, %v1065_v8, 0.0  ;;  %v524_v12 = vsel %vm513_vm1, %v1067_v9, 0.0  ;;  %v759_v13 = vsel %vm388_vm2, 1.0, %v947_v6  ;;  %s1090_s8 = sshll.u32 %s1186_s24, 2  ;;  %s367_s16 = scalar_lea.vmem %s1174_s6, %s1186_s24 }
  0x27   : > { %v760_v14 = vsel %vm389_vm3, 1.0, %v947_v6  ;;  %v525_v15 = vadd.f32 %v524_v12, %v523_v11  ;;  %v413_v51 = vsel %vm403_vm4, %v759_v13, 0.0  ;;  %s1098_s29 = scalar_lea.vmem %s1172_s4, %s1090_s8  ;;  %s1104_s12 = scalar_lea.vmem %s1170_s2, %s1090_s8  ;;  %378 = vst.msk [vmem:[%s367_s16] sm:$0x1] %vm376_vm6, %v947_v6 }
  0x28   : > { %v425_v16 = vsel %vm403_vm4, %v1065_v8, %v424_v10  ;;  %v414_v52 = vsel %vm403_vm4, %v760_v14, 0.0  ;;  %375 = vst.msk [vmem:[%s1098_s29] sm:$0xf] %vm372_vm5, %v947_v6  ;;  %s1118_s14 = scalar_lea.vmem %s1171_s3, %s1090_s8  ;;  %s364_s21 = scalar_lea.vmem %s1173_s5, %s1186_s24 }
  0x29   : > { %v396_v17 = vld.sshfl [vmem:[#allocation1] sm:$0xff pattern:$0x75316420]  ;;  %v397_v18 = vld.sshfl [vmem:[#allocation1 + $0x8] sm:$0xff pattern:$0x75316420]  ;;  %v427_v19 = vmul.f32 %v425_v16, %v379_v2  ;;  %526 = vadd.xlane.f32.xlu2 %v525_v15  ;;  %v415_v53 = vadd.f32 %v414_v52, %v413_v51 }
  0x2a   : > { %v400_v20 = vmul.f32 %v759_v13, %v396_v17  ;;  %v401_v21 = vmul.f32 %v760_v14, %v397_v18  ;;  %373 = vst.msk [vmem:[%s1104_s12] sm:$0xf] %vm372_vm5, %v947_v6 }
  0x2b   : > { %429 = vst [vmem:[#allocation1] ss:$2 sm:$0xff] %v427_v19 }
  0x2c   : > { %v404_v22 = vsel %vm403_vm4, %v400_v20, 0.0  ;;  %v405_v23 = vsel %vm403_vm4, %v401_v21, 0.0  ;;  %374 = vst.msk [vmem:[%s1118_s14] sm:$0xf] %vm372_vm5, %v947_v6 }
  0x2d   : > { %v406_v24 = vadd.f32 %v405_v23, %v404_v22  ;;  %v494_v56 = vrot.slane %v404_v22, 4  ;;  %v500_v59 = vrot.slane %v405_v23, 4  ;;  %377 = vst.msk [vmem:[%s364_s21] sm:$0x1] %vm376_vm6, %v947_v6 }
  0x2f   : > { %407 = vadd.xlane.f32.xlu0 %v406_v24  ;;  %v495_v0 = vadd.f32 %v494_v56, %v404_v22  ;;  %v501_v1 = vadd.f32 %v500_v59, %v405_v23 }
  0x31   : > { %v496_v7 = vrot.slane %v495_v0, 2  ;;  %v502_v10 = vrot.slane %v501_v1, 2 }
  0x32   : > { %v430_v25 = vld.sshfl [vmem:[#allocation1] sm:$0xff pattern:$0x75316420]  ;;  %v431_v26 = vld.sshfl [vmem:[#allocation1 + $0x8] sm:$0xff pattern:$0x75316420] }
  0x33   : > { %v434_v27 = vsel %vm403_vm4, %v430_v25, 0.0  ;;  %v435_v28 = vsel %vm403_vm4, %v431_v26, 0.0  ;;  %441 = vst [vmem:[#allocation1] ss:$2 sm:$0xff] %v379_v2  ;;  %v497_v15 = vadd.f32 %v496_v7, %v495_v0  ;;  %v503_v16 = vadd.f32 %v502_v10, %v501_v1 }
  0x34   : > { %v436_v29 = vadd.f32 %v435_v28, %v434_v27  ;;  %v512_v6 = vld [vmem:[%s364_s21] sm:$0x1] }
  0x35   : > { %v498_v17 = vrot.slane %v497_v15, 1  ;;  %v504_v18 = vrot.slane %v503_v16, 1 }
  0x36   : > { %437 = vadd.xlane.f32.xlu1 %v436_v29 }
  0x37   : > { %416 = vadd.xlane.f32.xlu0 %v415_v53  ;;  %v499_v22 = vadd.f32 %v498_v17, %v497_v15  ;;  %v505_v24 = vadd.f32 %v504_v18, %v503_v16 }
  0x3a   : > { %v442_v30 = vld.sshfl [vmem:[#allocation1] sm:$0xff pattern:$0x75316420]  ;;  %v443_v31 = vld.sshfl [vmem:[#allocation1 + $0x8] sm:$0xff pattern:$0x75316420] }
  0x3b   : > { %v446_v32 = vsel %vm403_vm4, %v442_v30, -inf  ;;  %v453_v33 = vsel %vm403_vm4, %v443_v31, -inf }
  0x3c   : > { %v447_v34 = vrot.slane %v446_v32, 4  ;;  %v454_v35 = vrot.slane %v453_v33, 4 }
  0x3e   : > { %v448_v36 = vmax.f32 %v446_v32, %v447_v34  ;;  %v455_v37 = vmax.f32 %v453_v33, %v454_v35  ;;  %v402_v35 = vld [vmem:[%s1104_s12] sm:$0xf] }
  0x40   : > { %v449_v38 = vrot.slane %v448_v36, 2  ;;  %v456_v39 = vrot.slane %v455_v37, 2 }
  0x42   : > { %v450_v40 = vmax.f32 %v448_v36, %v449_v38  ;;  %v457_v41 = vmax.f32 %v455_v37, %v456_v39  ;;  %v420_v38 = vld [vmem:[%s1098_s29] sm:$0xf] }
  0x44   : > { %v451_v42 = vrot.slane %v450_v40, 1  ;;  %v458_v43 = vrot.slane %v457_v41, 1 }
  0x46   : > { %v452_v44 = vmax.f32 %v450_v40, %v451_v42  ;;  %v459_v45 = vmax.f32 %v457_v41, %v458_v43  ;;  %v412_v42 = vld [vmem:[%s1118_s14] sm:$0xf] }
  0x48   : > { %v462_v46 = vrot.slane %v459_v45, 4 }
  0x4a   : > { %v463_v47 = vsel %vm403_vm4, %v452_v44, %v462_v46 }
  0x4b   : > { %v465_v48 = vsub.f32 %v379_v2, %v463_v47 }
  0x4d   : > { %v466_v49 = vmul.f32 1.442695, %v465_v48 }
  0x4f   : > { %825 = vpow2.f32 %v466_v49 }
  0x55   : > { %v826_v50 = vpop.eup %825 }
  0x56   : > { %469 = vst [vmem:[#allocation1] ss:$2 sm:$0xff] %v826_v50 }
  0x5d   : > { %v470_v54 = vld.sshfl [vmem:[#allocation1] sm:$0xff pattern:$0x75316420]  ;;  %v471_v55 = vld.sshfl [vmem:[#allocation1 + $0x8] sm:$0xff pattern:$0x75316420] }
  0x5e   : > { %v474_v57 = vsel %vm403_vm4, %v470_v54, 0.0  ;;  %v481_v58 = vsel %vm403_vm4, %v471_v55, 0.0 }
  0x5f   : > { %v475_v60 = vrot.slane %v474_v57, 4  ;;  %v482_v61 = vrot.slane %v481_v58, 4 }
  0x61   : > { %v476_v62 = vadd.f32 %v475_v60, %v474_v57  ;;  %v483_v63 = vadd.f32 %v482_v61, %v481_v58 }
  0x63   : > { %v477_v2 = vrot.slane %v476_v62, 2  ;;  %v484_v3 = vrot.slane %v483_v63, 2 }
  0x65   : > { %v478_v4 = vadd.f32 %v477_v2, %v476_v62  ;;  %v485_v5 = vadd.f32 %v484_v3, %v483_v63 }
  0x67   : > { %v479_v11 = vrot.slane %v478_v4, 1  ;;  %v486_v12 = vrot.slane %v485_v5, 1 }
  0x69   : > { %v480_v13 = vadd.f32 %v479_v11, %v478_v4  ;;  %v487_v14 = vadd.f32 %v486_v12, %v485_v5 }
  0x6b   : > { %827 = vlog2.f32 %v480_v13 }
  0x6c   : > { %829 = vlog2.f32 %v487_v14 }
  0x71   : > { %v828_v19 = vpop.eup %827 }
  0x72   : > { %v830_v20 = vpop.eup %829  ;;  %v489_v21 = vmul.f32 0.6931472, %v828_v19 }
  0x73   : > { %v491_v23 = vmul.f32 0.6931472, %v830_v20 }
  0x74   : > { %v492_v25 = vadd.f32 %v489_v21, %v452_v44 }
  0x75   : > { %v493_v26 = vadd.f32 %v491_v23, %v459_v45 }
  0x76   : > { %v506_v27 = vsub.f32 %v492_v25, %v499_v22 }
  0x77   : > { %v507_v28 = vsub.f32 %v493_v26, %v505_v24 }
  0x78   : > { %v510_v29 = vmul.f32 %v506_v27, %v1065_v8  ;;  %v522_v8 = vld [vmem:[%s367_s16] sm:$0x1] }
  0x79   : > { %v511_v30 = vmul.f32 %v507_v28, %v1067_v9 }
  0x7a   : > { %v514_v31 = vsel %vm513_vm1, %v510_v29, 0.0 }
  0x7b   : > { %v515_v32 = vsel %vm513_vm1, %v511_v30, 0.0 }
  0x7c   : > { %v516_v33 = vadd.f32 %v515_v32, %v514_v31 }
  0x7e   : > { %517 = vadd.xlane.f32.xlu1 %v516_v33 }
  0x9c   : > { %v527_v9 = vpop.xlane.xlu2 %526 }
  0x9d   : > { %v528_v34 = vadd.f32 %v527_v9, %v522_v8 }
  0x9f   : > { %529 = vst.msk [vmem:[%s367_s16] sm:$0x1] %vm376_vm6, %v528_v34 }
  0xa2   : > { %v408_v36 = vpop.xlane.xlu0 %407 }
  0xa3   : > { %v409_v37 = vadd.f32 %v408_v36, %v402_v35 }
  0xa5   : > { %411 = vst.msk [vmem:[%s1104_s12] sm:$0xf] %vm372_vm5, %v409_v37 }
  0xa9   : > { %v438_v39 = vpop.xlane.xlu1 %437 }
  0xaa   : > { %v439_v40 = vadd.f32 %v438_v39, %v420_v38  ;;  %v417_v41 = vpop.xlane.xlu0 %416 }
  0xab   : > { %v418_v43 = vadd.f32 %v417_v41, %v412_v42 }
  0xac   : > { %440 = vst.msk [vmem:[%s1098_s29] sm:$0xf] %vm372_vm5, %v439_v40 }
  0xad   : > { %419 = vst.msk [vmem:[%s1118_s14] sm:$0xf] %vm372_vm5, %v418_v43 }
  0xf1   : > { %v518_v44 = vpop.xlane.xlu1 %517 }
  0xf2   : > { %v519_v45 = vadd.f32 %v518_v44, %v512_v6 }
  0xf4   : > { %521 = vst.msk [vmem:[%s364_s21] sm:$0x1] %vm376_vm6, %v519_v45 }
  0xf5 PF: > { %s23_s26 = sadd.s32 1, %s945_s26   ;;  %s1178_s21 = smov %s929_s22 }
  0xf6   : > { %p20_p0 = scmp.ge.s32.totalorder %s23_s26, 4   ;;  %s1179_s22 = smov %s933_s23 }
  0xf7   : > { %s1180_s23 = smov %s1032_s9  ;;  %s1181_s24 = smov %s941_s25 }
  0xf8   : > { %s1182_s25 = smov %s1184_s28  ;;  %22 = sbr.rel (!%p20_p0) target bundleno = 6 (0x6), region = 133 }
  0xfd   :  { %601 = vsyncpa [#allocation3], 1 }
  0xfe   :  { %603 = vsyncpa [#allocation3 + $0x1], 1 }
  0xff   :  { %604 = vsyncpa [#allocation5], 1 }
 0x100   :  { %606 = vsyncpa [#allocation5 + $0x1], 1 }

</bundles_post_ra>
